<compile_context>
chip_gen: v7x
topology: tpu7x:2x2x1
jax: 0.10.0
libtpu: 0.0.40
codegen_flags: <defaults>
</compile_context>

<pallas_src>
import functools

import jax
import jax.numpy as jnp
from jax.experimental import pallas as pl
from jax.experimental.pallas import tpu as pltpu

LANE = 128


def _round_up(x, m):
    return (x + m - 1) // m * m


def policy_kernel(x_ref,
                  w1_ref, b1_ref,
                  w2_ref, b2_ref,
                  w3_ref, b3_ref,
                  w4_ref, b4_ref,
                  out_ref):
    """One batch tile: full MLP forward + softmax, everything resident in VMEM."""
    x = x_ref[...]

    # l1 + ReLU (MXU matmul, f32 accumulate)
    h1 = jnp.dot(x, w1_ref[...], preferred_element_type=jnp.float32) + b1_ref[...]
    h1 = jnp.maximum(h1, 0.0)

    # l2 + ReLU
    h2 = jnp.dot(h1, w2_ref[...], preferred_element_type=jnp.float32) + b2_ref[...]
    h2 = jnp.maximum(h2, 0.0)

    # l3 + ReLU
    h3 = jnp.dot(h2, w3_ref[...], preferred_element_type=jnp.float32) + b3_ref[...]
    h3 = jnp.maximum(h3, 0.0)

    # l4 (logits, padded to 128 lanes; padded columns carry bias -1e30)
    logits = jnp.dot(h3, w4_ref[...], preferred_element_type=jnp.float32) + b4_ref[...]

    # numerically stable softmax over the (padded) action axis;
    # padded columns -> exp(-huge) == 0 and contribute nothing to the sum.
    m = jnp.max(logits, axis=-1, keepdims=True)
    e = jnp.exp(logits - m)
    denom = jnp.sum(e, axis=-1, keepdims=True)
    out_ref[...] = (e / denom).astype(out_ref.dtype)


@functools.partial(jax.jit, static_argnames=())
def policy_forward(x, params):
    """x: [B, state_dim] float32 -> probs [B, action_dim] float32."""
    (w1, b1), (w2, b2), (w3, b3), (w4, b4) = params
    B, state_dim = x.shape
    h1_dim = w1.shape[1]
    h2_dim = w2.shape[1]
    h3_dim = w3.shape[1]
    action_dim = w4.shape[1]

    # ---- lane-dense padding of the "edge" dims (state_dim, action_dim) ----
    in_pad = _round_up(state_dim, LANE)
    out_pad = _round_up(action_dim, LANE)

    x_p = jnp.pad(x, ((0, 0), (0, in_pad - state_dim)))
    w1_p = jnp.pad(w1, ((0, in_pad - state_dim), (0, 0)))
    w4_p = jnp.pad(w4, ((0, 0), (0, out_pad - action_dim)))
    # padded logits get a huge negative bias -> softmax gives them exactly 0
    b4_p = jnp.pad(b4, ((0, 0), (0, out_pad - action_dim)),
                   constant_values=-1e30)

    # ---- batch tiling: big batches are split across grid steps (and TCs on v7x) ----
    TB = min(128, _round_up(B, 8))
    B_pad = _round_up(B, TB)
    if B_pad != B:
        x_p = jnp.pad(x_p, ((0, B_pad - B), (0, 0)))
    grid = (B_pad // TB,)

    # Weights/biases use a constant index_map -> same block every step, so the
    # pipeline keeps them resident in VMEM across the whole grid.
    const = lambda i: (0, 0)
    row = lambda i: (i, 0)

    out = pl.pallas_call(
        policy_kernel,
        out_shape=jax.ShapeDtypeStruct((B_pad, out_pad), jnp.float32),
        grid_spec=pltpu.PrefetchScalarGridSpec(
            num_scalar_prefetch=0,
            grid=grid,
            in_specs=[
                pl.BlockSpec((TB, in_pad), row),        # x tile
                pl.BlockSpec((in_pad, h1_dim), const),  # w1 (row-padded)
                pl.BlockSpec((1, h1_dim), const),       # b1
                pl.BlockSpec((h1_dim, h2_dim), const),  # w2
                pl.BlockSpec((1, h2_dim), const),       # b2
                pl.BlockSpec((h2_dim, h3_dim), const),  # w3
                pl.BlockSpec((1, h3_dim), const),       # b3
                pl.BlockSpec((h3_dim, out_pad), const), # w4 (lane-padded)
                pl.BlockSpec((1, out_pad), const),      # b4 (lane-padded)
            ],
            out_specs=pl.BlockSpec((TB, out_pad), row),
        ),
        compiler_params=pltpu.CompilerParams(
            dimension_semantics=("parallel",)),
    )(x_p, w1_p, b1, w2, b2, w3, b3, w4_p, b4_p)

    return out[:B, :action_dim]


def init_linear(key, in_dim, out_dim):
    """Deterministic init mimicking PyTorch nn.Linear default (U[-1/sqrt(fan_in), 1/sqrt(fan_in)])."""
    kw, kb = jax.random.split(key)
    bound = 1.0 / jnp.sqrt(jnp.float32(in_dim))
    # weight stored as [in, out] (transposed relative to PyTorch's [out, in])
    w = jax.random.uniform(kw, (in_dim, out_dim), jnp.float32, -bound, bound)
    b = jax.random.uniform(kb, (1, out_dim), jnp.float32, -bound, bound)
    return w, b


def _reference_forward(x, params):
    """Pure-JAX reference (f32)."""
    (w1, b1), (w2, b2), (w3, b3), (w4, b4) = params
    h = jnp.maximum(x @ w1 + b1, 0.0)
    h = jnp.maximum(h @ w2 + b2, 0.0)
    h = jnp.maximum(h @ w3 + b3, 0.0)
    logits = h @ w4 + b4
    return jax.nn.softmax(logits, axis=1)


if __name__ == "__main__":
    state_dim = 32
    action_dim = 8
    batch = 8

    key = jax.random.PRNGKey(0)
    k_x, k1, k2, k3, k4 = jax.random.split(key, 5)

    params = (
        init_linear(k1, state_dim, 128),
        init_linear(k2, 128, 256),
        init_linear(k3, 256, 128),
        init_linear(k4, 128, action_dim),
    )

    x = jax.random.normal(k_x, (batch, state_dim), jnp.float32)

    probs = policy_forward(x, params)
    probs = jax.block_until_ready(probs)

    # sanity: shape, valid probabilities, rows sum to 1
    assert probs.shape == (batch, action_dim)
    row_sums = jnp.sum(probs, axis=1)
    assert bool(jnp.all(jnp.abs(row_sums - 1.0) < 1e-3)), row_sums
    assert bool(jnp.all(probs >= 0.0)) and bool(jnp.all(probs <= 1.0))

    ref = _reference_forward(x, params)
    assert bool(jnp.max(jnp.abs(probs - ref)) < 1e-2), jnp.max(jnp.abs(probs - ref))

    print("KERNEL_OK")
</pallas_src>

<mosaic_0001>
module attributes {stable_mosaic.version = 11 : i64} {
  func.func @policy_kernel(%arg0: i32, %arg1: memref<8x128xf32, #tpu.memory_space<vmem>>, %arg2: memref<128x128xf32, #tpu.memory_space<vmem>>, %arg3: memref<1x128xf32, #tpu.memory_space<vmem>>, %arg4: memref<128x256xf32, #tpu.memory_space<vmem>>, %arg5: memref<1x256xf32, #tpu.memory_space<vmem>>, %arg6: memref<256x128xf32, #tpu.memory_space<vmem>>, %arg7: memref<1x128xf32, #tpu.memory_space<vmem>>, %arg8: memref<128x128xf32, #tpu.memory_space<vmem>>, %arg9: memref<1x128xf32, #tpu.memory_space<vmem>>, %arg10: memref<8x128xf32, #tpu.memory_space<vmem>>) attributes {dimension_semantics = [#tpu.dimension_semantics<parallel>], iteration_bounds = array<i64: 1>, scalar_prefetch = 0 : i64, scratch_operands = 0 : i64, tpu.core_type = #tpu.core_type<tc>, window_params = [{transform_indices = @transform_0, window_bounds = array<i64: 8, 128>}, {pipeline_mode = #tpu.pipeline_mode<synchronous>, transform_indices = @transform_1, window_bounds = array<i64: 128, 128>}, {pipeline_mode = #tpu.pipeline_mode<synchronous>, transform_indices = @transform_2, window_bounds = array<i64: 1, 128>}, {pipeline_mode = #tpu.pipeline_mode<synchronous>, transform_indices = @transform_3, window_bounds = array<i64: 128, 256>}, {pipeline_mode = #tpu.pipeline_mode<synchronous>, transform_indices = @transform_4, window_bounds = array<i64: 1, 256>}, {pipeline_mode = #tpu.pipeline_mode<synchronous>, transform_indices = @transform_5, window_bounds = array<i64: 256, 128>}, {pipeline_mode = #tpu.pipeline_mode<synchronous>, transform_indices = @transform_6, window_bounds = array<i64: 1, 128>}, {pipeline_mode = #tpu.pipeline_mode<synchronous>, transform_indices = @transform_7, window_bounds = array<i64: 128, 128>}, {pipeline_mode = #tpu.pipeline_mode<synchronous>, transform_indices = @transform_8, window_bounds = array<i64: 1, 128>}, {transform_indices = @transform_9, window_bounds = array<i64: 8, 128>}]} {
    %c0 = arith.constant 0 : index
    %c0_0 = arith.constant 0 : index
    %0 = vector.load %arg1[%c0, %c0_0] : memref<8x128xf32, #tpu.memory_space<vmem>>, vector<8x128xf32>
    %c0_1 = arith.constant 0 : index
    %c0_2 = arith.constant 0 : index
    %1 = vector.load %arg2[%c0_1, %c0_2] : memref<128x128xf32, #tpu.memory_space<vmem>>, vector<128x128xf32>
    %cst = arith.constant dense<0.000000e+00> : vector<8x128xf32>
    %2 = tpu.matmul %0, %1, %cst {dimension_numbers = #tpu.dot_dimension_numbers<[1], [0], [0], [1], [0, 0, 1, 1], [], []>} : vector<8x128xf32>, vector<128x128xf32>, vector<8x128xf32> -> vector<8x128xf32>
    %c0_3 = arith.constant 0 : index
    %c0_4 = arith.constant 0 : index
    %3 = vector.load %arg3[%c0_3, %c0_4] : memref<1x128xf32, #tpu.memory_space<vmem>>, vector<1x128xf32>
    %4 = vector.broadcast %3 : vector<1x128xf32> to vector<8x128xf32>
    %5 = arith.addf %2, %4 : vector<8x128xf32>
    %cst_5 = arith.constant 0.000000e+00 : f32
    %6 = vector.broadcast %cst_5 : f32 to vector<8x128xf32>
    %7 = arith.maximumf %5, %6 : vector<8x128xf32>
    %c0_6 = arith.constant 0 : index
    %c0_7 = arith.constant 0 : index
    %8 = vector.load %arg4[%c0_6, %c0_7] : memref<128x256xf32, #tpu.memory_space<vmem>>, vector<128x256xf32>
    %cst_8 = arith.constant dense<0.000000e+00> : vector<8x256xf32>
    %9 = tpu.matmul %7, %8, %cst_8 {dimension_numbers = #tpu.dot_dimension_numbers<[1], [0], [0], [1], [0, 0, 1, 1], [], []>} : vector<8x128xf32>, vector<128x256xf32>, vector<8x256xf32> -> vector<8x256xf32>
    %c0_9 = arith.constant 0 : index
    %c0_10 = arith.constant 0 : index
    %10 = vector.load %arg5[%c0_9, %c0_10] : memref<1x256xf32, #tpu.memory_space<vmem>>, vector<1x256xf32>
    %11 = vector.broadcast %10 : vector<1x256xf32> to vector<8x256xf32>
    %12 = arith.addf %9, %11 : vector<8x256xf32>
    %cst_11 = arith.constant 0.000000e+00 : f32
    %13 = vector.broadcast %cst_11 : f32 to vector<8x256xf32>
    %14 = arith.maximumf %12, %13 : vector<8x256xf32>
    %c0_12 = arith.constant 0 : index
    %c0_13 = arith.constant 0 : index
    %15 = vector.load %arg6[%c0_12, %c0_13] : memref<256x128xf32, #tpu.memory_space<vmem>>, vector<256x128xf32>
    %cst_14 = arith.constant dense<0.000000e+00> : vector<8x128xf32>
    %16 = tpu.matmul %14, %15, %cst_14 {dimension_numbers = #tpu.dot_dimension_numbers<[1], [0], [0], [1], [0, 0, 1, 1], [], []>} : vector<8x256xf32>, vector<256x128xf32>, vector<8x128xf32> -> vector<8x128xf32>
    %c0_15 = arith.constant 0 : index
    %c0_16 = arith.constant 0 : index
    %17 = vector.load %arg7[%c0_15, %c0_16] : memref<1x128xf32, #tpu.memory_space<vmem>>, vector<1x128xf32>
    %18 = vector.broadcast %17 : vector<1x128xf32> to vector<8x128xf32>
    %19 = arith.addf %16, %18 : vector<8x128xf32>
    %cst_17 = arith.constant 0.000000e+00 : f32
    %20 = vector.broadcast %cst_17 : f32 to vector<8x128xf32>
    %21 = arith.maximumf %19, %20 : vector<8x128xf32>
    %c0_18 = arith.constant 0 : index
    %c0_19 = arith.constant 0 : index
    %22 = vector.load %arg8[%c0_18, %c0_19] : memref<128x128xf32, #tpu.memory_space<vmem>>, vector<128x128xf32>
    %cst_20 = arith.constant dense<0.000000e+00> : vector<8x128xf32>
    %23 = tpu.matmul %21, %22, %cst_20 {dimension_numbers = #tpu.dot_dimension_numbers<[1], [0], [0], [1], [0, 0, 1, 1], [], []>} : vector<8x128xf32>, vector<128x128xf32>, vector<8x128xf32> -> vector<8x128xf32>
    %c0_21 = arith.constant 0 : index
    %c0_22 = arith.constant 0 : index
    %24 = vector.load %arg9[%c0_21, %c0_22] : memref<1x128xf32, #tpu.memory_space<vmem>>, vector<1x128xf32>
    %25 = vector.broadcast %24 : vector<1x128xf32> to vector<8x128xf32>
    %26 = arith.addf %23, %25 : vector<8x128xf32>
    %cst_23 = arith.constant dense<0xFF800000> : vector<8xf32>
    %27 = vector.multi_reduction <maximumf>, %26, %cst_23 [1] : vector<8x128xf32> to vector<8xf32>
    %28 = vector.shape_cast %27 : vector<8xf32> to vector<8x1xf32>
    %29 = vector.broadcast %28 : vector<8x1xf32> to vector<8x128xf32>
    %30 = arith.subf %26, %29 : vector<8x128xf32>
    %31 = math.exp %30 : vector<8x128xf32>
    %cst_24 = arith.constant dense<0.000000e+00> : vector<8xf32>
    %32 = vector.multi_reduction <add>, %31, %cst_24 [1] : vector<8x128xf32> to vector<8xf32>
    %33 = vector.shape_cast %32 : vector<8xf32> to vector<8x1xf32>
    %34 = vector.broadcast %33 : vector<8x1xf32> to vector<8x128xf32>
    %35 = arith.divf %31, %34 : vector<8x128xf32>
    %c0_25 = arith.constant 0 : index
    %c0_26 = arith.constant 0 : index
    %36 = vector.load %arg10[%c0_25, %c0_26] : memref<8x128xf32, #tpu.memory_space<vmem>>, vector<8x128xf32>
    tpu.vector_store %arg10[%c0_25, %c0_26], %35 {strides = array<i32>} : memref<8x128xf32, #tpu.memory_space<vmem>>, vector<8x128xf32>,
    return
  }
  func.func @transform_0(%arg0: i32) -> (i32, i32) {
    %c0_i32 = arith.constant 0 : i32
    %c0_i32_0 = arith.constant 0 : i32
    return %arg0, %c0_i32 : i32, i32
  }
  func.func @transform_1(%arg0: i32) -> (i32, i32) {
    %c0_i32 = arith.constant 0 : i32
    %c0_i32_0 = arith.constant 0 : i32
    %c0_i32_1 = arith.constant 0 : i32
    return %c0_i32, %c0_i32_0 : i32, i32
  }
  func.func @transform_2(%arg0: i32) -> (i32, i32) {
    %c0_i32 = arith.constant 0 : i32
    %c0_i32_0 = arith.constant 0 : i32
    %c0_i32_1 = arith.constant 0 : i32
    return %c0_i32, %c0_i32_0 : i32, i32
  }
  func.func @transform_3(%arg0: i32) -> (i32, i32) {
    %c0_i32 = arith.constant 0 : i32
    %c0_i32_0 = arith.constant 0 : i32
    %c0_i32_1 = arith.constant 0 : i32
    return %c0_i32, %c0_i32_0 : i32, i32
  }
  func.func @transform_4(%arg0: i32) -> (i32, i32) {
    %c0_i32 = arith.constant 0 : i32
    %c0_i32_0 = arith.constant 0 : i32
    %c0_i32_1 = arith.constant 0 : i32
    return %c0_i32, %c0_i32_0 : i32, i32
  }
  func.func @transform_5(%arg0: i32) -> (i32, i32) {
    %c0_i32 = arith.constant 0 : i32
    %c0_i32_0 = arith.constant 0 : i32
    %c0_i32_1 = arith.constant 0 : i32
    return %c0_i32, %c0_i32_0 : i32, i32
  }
  func.func @transform_6(%arg0: i32) -> (i32, i32) {
    %c0_i32 = arith.constant 0 : i32
    %c0_i32_0 = arith.constant 0 : i32
    %c0_i32_1 = arith.constant 0 : i32
    return %c0_i32, %c0_i32_0 : i32, i32
  }
  func.func @transform_7(%arg0: i32) -> (i32, i32) {
    %c0_i32 = arith.constant 0 : i32
    %c0_i32_0 = arith.constant 0 : i32
    %c0_i32_1 = arith.constant 0 : i32
    return %c0_i32, %c0_i32_0 : i32, i32
  }
  func.func @transform_8(%arg0: i32) -> (i32, i32) {
    %c0_i32 = arith.constant 0 : i32
    %c0_i32_0 = arith.constant 0 : i32
    %c0_i32_1 = arith.constant 0 : i32
    return %c0_i32, %c0_i32_0 : i32, i32
  }
  func.func @transform_9(%arg0: i32) -> (i32, i32) {
    %c0_i32 = arith.constant 0 : i32
    %c0_i32_0 = arith.constant 0 : i32
    return %arg0, %c0_i32 : i32, i32
  }
}

</mosaic_0001>

<bundles_post_ra>
// kernel: policy_forward.1
= control target key start
LH: loop header
LB: loop body
LE: loop exit
PB: predicated region body
PF: predicated region fallthrough
CT: control target
= control target key end

     0   :  { %v758_v3 = vmov 0.0|0.0   ;;  %vm759_vm0 = vmmov 0   ;;  %v760_v6 = vmov 0.0   ;;  %s1148_s0 = inlined_call_operand.vmem [shape: f32[8,128], index: 0, kind: input, shape index: {}]   ;;  %s1149_s1 = inlined_call_operand.vmem [shape: f32[128,128], index: 1, kind: input, shape index: {}]   ;;  %s1150_s2 = inlined_call_operand.vmem [shape: f32[1,128], index: 2, kind: input, shape index: {}]   ;;  %s1151_s3 = inlined_call_operand.vmem [shape: f32[128,256], index: 3, kind: input, shape index: {}]   ;;  %s1152_s4 = inlined_call_operand.vmem [shape: f32[1,256], index: 4, kind: input, shape index: {}]   ;;  %s1153_s5 = inlined_call_operand.vmem [shape: f32[256,128], index: 5, kind: input, shape index: {}]   ;;  %s1154_s6 = inlined_call_operand.vmem [shape: f32[1,128], index: 6, kind: input, shape index: {}]   ;;  %s1155_s7 = inlined_call_operand.vmem [shape: f32[128,128], index: 7, kind: input, shape index: {}]   ;;  %s1156_s8 = inlined_call_operand.vmem [shape: f32[1,128], index: 8, kind: input, shape index: {}]   ;;  %s1157_s9 = inlined_call_operand.hbm [shape: f32[8,128], index: 9, kind: output, shape index: {}]  }
   0x1   :  { %v34_v0 = vld [vmem:[%s1149_s1] sm:$0xff]  ;;  %v35_v1 = vld [vmem:[%s1149_s1 + $0x8] sm:$0xff]  ;;  %v36_v2 = vld [vmem:[%s1149_s1 + $0x10] sm:$0xff]  ;;  %614 = vmatprep.subr.bf16.mxu0 %v758_v3  ;;  %576 = vmatprep.mubr.msk.f32.mxu0 %vm759_vm0, %v760_v6 }
   0x2   :  { %v615_v4 = vpack.c.bf16 %v35_v1, %v34_v0  ;;  %v37_v5 = vld [vmem:[%s1149_s1 + $0x18] sm:$0xff]  ;;  %236 = vmatprep.mubr.f32.mxu1 %v760_v6  ;;  %v38_v8 = vld [vmem:[%s1149_s1 + $0x20] sm:$0xff]  ;;  %v39_v9 = vld [vmem:[%s1149_s1 + $0x28] sm:$0xff] }
   0x3   :  { %v618_v7 = vpack.c.bf16 %v37_v5, %v36_v2  ;;  %v129_v10 = vld [vmem:[%s1151_s3 + $0x8] sm:$0xff]  ;;  %v40_v11 = vld [vmem:[%s1149_s1 + $0x30] sm:$0xff]  ;;  %v41_v12 = vld [vmem:[%s1149_s1 + $0x38] sm:$0xff]  ;;  %v621_v16 = vpack.c.bf16 %v39_v9, %v38_v8 }
   0x4   :  { %616 = vmatpush3.bf16.msra.mxu0 %v615_v4  ;;  %v131_v13 = vld [vmem:[%s1151_s3 + $0x18] sm:$0xff]  ;;  %v128_v14 = vld [vmem:[%s1151_s3] sm:$0xff]  ;;  %v130_v15 = vld [vmem:[%s1151_s3 + $0x10] sm:$0xff]  ;;  %v624_v27 = vpack.c.bf16 %v41_v12, %v40_v11 }
   0x5   :  { %617 = vmatprep.subr.bf16.mxu0 %v758_v3  ;;  %v638_v17 = vpack.c.bf16 %v131_v13, %v129_v10  ;;  %v640_v18 = vpack.c.bf16 %v130_v15, %v128_v14  ;;  %v133_v19 = vld [vmem:[%s1151_s3 + $0x28] sm:$0xff]  ;;  %v135_v20 = vld [vmem:[%s1151_s3 + $0x38] sm:$0xff]  ;;  %v132_v21 = vld [vmem:[%s1151_s3 + $0x20] sm:$0xff] }
   0x6   :  { %v642_v22 = vpack.c.bf16 %v135_v20, %v133_v19  ;;  %v134_v23 = vld [vmem:[%s1151_s3 + $0x30] sm:$0xff]  ;;  %v137_v24 = vld [vmem:[%s1151_s3 + $0x48] sm:$0xff]  ;;  %v139_v25 = vld [vmem:[%s1151_s3 + $0x58] sm:$0xff] }
   0x7   :  { %639 = vmatprep.subr.bf16.mxu1 %v638_v17  ;;  %v644_v26 = vpack.c.bf16 %v134_v23, %v132_v21  ;;  %v42_v28 = vld [vmem:[%s1149_s1 + $0x40] sm:$0xff]  ;;  %v646_v29 = vpack.c.bf16 %v139_v25, %v137_v24  ;;  %v138_v31 = vld [vmem:[%s1151_s3 + $0x50] sm:$0xff]  ;;  %v43_v32 = vld [vmem:[%s1149_s1 + $0x48] sm:$0xff] }
   0x8   :  { %619 = vmatpush3.bf16.msra.mxu0 %v618_v7  ;;  %641 = vmatpush1.bf16.msra.mxu1 %v640_v18  ;;  %v136_v30 = vld [vmem:[%s1151_s3 + $0x40] sm:$0xff]  ;;  %v141_v33 = vld [vmem:[%s1151_s3 + $0x68] sm:$0xff]  ;;  %v143_v34 = vld [vmem:[%s1151_s3 + $0x78] sm:$0xff]  ;;  %v627_v37 = vpack.c.bf16 %v43_v32, %v42_v28 }
   0x9   :  { %620 = vmatprep.subr.bf16.mxu0 %v758_v3  ;;  %643 = vmatprep.subr.bf16.mxu1 %v642_v22  ;;  %v44_v35 = vld [vmem:[%s1149_s1 + $0x50] sm:$0xff]  ;;  %v648_v36 = vpack.c.bf16 %v138_v31, %v136_v30  ;;  %v650_v38 = vpack.c.bf16 %v143_v34, %v141_v33  ;;  %v140_v39 = vld [vmem:[%s1151_s3 + $0x60] sm:$0xff] }
   0xa   :  { %v142_v40 = vld [vmem:[%s1151_s3 + $0x70] sm:$0xff] }
   0xc   :  { %622 = vmatpush3.bf16.msra.mxu0 %v621_v16  ;;  %645 = vmatpush1.bf16.msra.mxu1 %v644_v26 }
   0xd   :  { %623 = vmatprep.subr.bf16.mxu0 %v758_v3  ;;  %647 = vmatprep.subr.bf16.mxu1 %v646_v29 }
  0x10   :  { %625 = vmatpush3.bf16.msra.mxu0 %v624_v27 }
  0x11   :  { %14 = vsyncpa [#allocation3], 0  ;;  %626 = vmatprep.subr.bf16.mxu0 %v758_v3  ;;  %v45_v41 = vld [vmem:[%s1149_s1 + $0x58] sm:$0xff]  ;;  %v145_v42 = vld [vmem:[%s1151_s3 + $0x88] sm:$0xff]  ;;  %649 = vmatpush1.bf16.msra.mxu1 %v648_v36  ;;  %v652_v44 = vpack.c.bf16 %v142_v40, %v140_v39 }
  0x12   :  { %v147_v43 = vld [vmem:[%s1151_s3 + $0x98] sm:$0xff]  ;;  %v630_v45 = vpack.c.bf16 %v45_v41, %v44_v35  ;;  %v46_v46 = vld [vmem:[%s1149_s1 + $0x60] sm:$0xff]  ;;  %651 = vmatprep.subr.bf16.mxu1 %v650_v38  ;;  %v146_v49 = vld [vmem:[%s1151_s3 + $0x90] sm:$0xff] }
  0x13   :  { %v654_v47 = vpack.c.bf16 %v147_v43, %v145_v42  ;;  %v144_v48 = vld [vmem:[%s1151_s3 + $0x80] sm:$0xff]  ;;  %v47_v50 = vld [vmem:[%s1149_s1 + $0x68] sm:$0xff]  ;;  %v151_v52 = vld [vmem:[%s1151_s3 + $0xb8] sm:$0xff] }
  0x14   :  { %628 = vmatpush3.bf16.msra.mxu0 %v627_v37  ;;  %v149_v51 = vld [vmem:[%s1151_s3 + $0xa8] sm:$0xff]  ;;  %v656_v53 = vpack.c.bf16 %v146_v49, %v144_v48  ;;  %v633_v54 = vpack.c.bf16 %v47_v50, %v46_v46  ;;  %v48_v55 = vld [vmem:[%s1149_s1 + $0x70] sm:$0xff]  ;;  %v148_v57 = vld [vmem:[%s1151_s3 + $0xa0] sm:$0xff] }
  0x15   :  { %629 = vmatprep.subr.bf16.mxu0 %v758_v3  ;;  %653 = vmatpush1.bf16.msra.mxu1 %v652_v44  ;;  %v658_v56 = vpack.c.bf16 %v151_v52, %v149_v51  ;;  %v150_v58 = vld [vmem:[%s1151_s3 + $0xb0] sm:$0xff]  ;;  %v49_v59 = vld [vmem:[%s1149_s1 + $0x78] sm:$0xff]  ;;  %v153_v60 = vld [vmem:[%s1151_s3 + $0xc8] sm:$0xff] }
  0x16   :  { %655 = vmatprep.subr.bf16.mxu1 %v654_v47  ;;  %v155_v61 = vld [vmem:[%s1151_s3 + $0xd8] sm:$0xff]  ;;  %v660_v62 = vpack.c.bf16 %v150_v58, %v148_v57  ;;  %v636_v63 = vpack.c.bf16 %v49_v59, %v48_v55  ;;  %v152_v1 = vld [vmem:[%s1151_s3 + $0xc0] sm:$0xff]  ;;  %v154_v2 = vld [vmem:[%s1151_s3 + $0xd0] sm:$0xff] }
  0x17   :  { %v662_v0 = vpack.c.bf16 %v155_v61, %v153_v60  ;;  %v664_v4 = vpack.c.bf16 %v154_v2, %v152_v1  ;;  %v33_v5 = vld [vmem:[%s1148_s0] sm:$0xff]  ;;  %v157_v7 = vld [vmem:[%s1151_s3 + $0xe8] sm:$0xff]  ;;  %v159_v8 = vld [vmem:[%s1151_s3 + $0xf8] sm:$0xff] }
  0x18   :  { %631 = vmatpush3.bf16.msra.mxu0 %v630_v45  ;;  %v666_v9 = vpack.c.bf16 %v159_v8, %v157_v7  ;;  %v156_v10 = vld [vmem:[%s1151_s3 + $0xe0] sm:$0xff]  ;;  %v158_v11 = vld [vmem:[%s1151_s3 + $0xf0] sm:$0xff]  ;;  %v262_v14 = vld [vmem:[%s1153_s5 + $0x88] sm:$0xff] }
  0x19   :  { %632 = vmatprep.subr.bf16.mxu0 %v758_v3  ;;  %657 = vmatpush1.bf16.msra.mxu1 %v656_v53  ;;  %v668_v12 = vpack.c.bf16 %v158_v11, %v156_v10  ;;  %v261_v13 = vld [vmem:[%s1153_s5 + $0x80] sm:$0xff]  ;;  %v246_v17 = vld [vmem:[%s1153_s5 + $0x8] sm:$0xff]  ;;  %v263_v18 = vld [vmem:[%s1153_s5 + $0x90] sm:$0xff] }
  0x1a   :  { %659 = vmatprep.subr.bf16.mxu1 %v658_v56  ;;  %v245_v15 = vld [vmem:[%s1153_s5] sm:$0xff]  ;;  %v670_v16 = vpack.c.bf16 %v262_v14, %v261_v13  ;;  %v264_v19 = vld [vmem:[%s1153_s5 + $0x98] sm:$0xff]  ;;  %v247_v22 = vld [vmem:[%s1153_s5 + $0x10] sm:$0xff] }
  0x1b   :  { %v672_v20 = vpack.c.bf16 %v246_v17, %v245_v15  ;;  %v674_v21 = vpack.c.bf16 %v264_v19, %v263_v18  ;;  %v248_v23 = vld [vmem:[%s1153_s5 + $0x18] sm:$0xff]  ;;  %v265_v24 = vld [vmem:[%s1153_s5 + $0xa0] sm:$0xff]  ;;  %v266_v25 = vld [vmem:[%s1153_s5 + $0xa8] sm:$0xff] }
  0x1c   :  { %634 = vmatpush3.bf16.msra.mxu0 %v633_v54  ;;  %v676_v26 = vpack.c.bf16 %v248_v23, %v247_v22  ;;  %v678_v27 = vpack.c.bf16 %v266_v25, %v265_v24  ;;  %v249_v28 = vld [vmem:[%s1153_s5 + $0x20] sm:$0xff]  ;;  %v250_v29 = vld [vmem:[%s1153_s5 + $0x28] sm:$0xff]  ;;  %v267_v30 = vld [vmem:[%s1153_s5 + $0xb0] sm:$0xff] }
  0x1d   :  { %635 = vmatprep.subr.bf16.mxu0 %v758_v3  ;;  %661 = vmatpush1.bf16.msra.mxu1 %v660_v62  ;;  %v268_v31 = vld [vmem:[%s1153_s5 + $0xb8] sm:$0xff]  ;;  %v680_v32 = vpack.c.bf16 %v250_v29, %v249_v28  ;;  %v251_v34 = vld [vmem:[%s1153_s5 + $0x30] sm:$0xff]  ;;  %v269_v36 = vld [vmem:[%s1153_s5 + $0xc0] sm:$0xff] }
  0x1e   :  { %663 = vmatprep.subr.bf16.mxu1 %v662_v0  ;;  %v682_v33 = vpack.c.bf16 %v268_v31, %v267_v30  ;;  %v252_v35 = vld [vmem:[%s1153_s5 + $0x38] sm:$0xff]  ;;  %v270_v37 = vld [vmem:[%s1153_s5 + $0xc8] sm:$0xff]  ;;  %v253_v40 = vld [vmem:[%s1153_s5 + $0x40] sm:$0xff] }
  0x1f   :  { %v684_v38 = vpack.c.bf16 %v252_v35, %v251_v34  ;;  %v686_v39 = vpack.c.bf16 %v270_v37, %v269_v36  ;;  %v254_v41 = vld [vmem:[%s1153_s5 + $0x48] sm:$0xff]  ;;  %v271_v42 = vld [vmem:[%s1153_s5 + $0xd0] sm:$0xff]  ;;  %v272_v43 = vld [vmem:[%s1153_s5 + $0xd8] sm:$0xff] }
  0x20   :  { %637 = vmatpush3.bf16.msra.mxu0 %v636_v63  ;;  %v688_v44 = vpack.c.bf16 %v254_v41, %v253_v40  ;;  %v690_v45 = vpack.c.bf16 %v272_v43, %v271_v42  ;;  %v255_v46 = vld [vmem:[%s1153_s5 + $0x50] sm:$0xff]  ;;  %v256_v47 = vld [vmem:[%s1153_s5 + $0x58] sm:$0xff]  ;;  %v273_v48 = vld [vmem:[%s1153_s5 + $0xe0] sm:$0xff] }
  0x21   :  { %665 = vmatpush1.bf16.msra.mxu1 %v664_v4  ;;  %671 = vmatprep.subr.bf16.mxu0 %v670_v16  ;;  %v274_v49 = vld [vmem:[%s1153_s5 + $0xe8] sm:$0xff]  ;;  %v692_v50 = vpack.c.bf16 %v256_v47, %v255_v46  ;;  %v472_v52 = vld [vmem:[%s1150_s2] ss:$0 sm:$0xff]  ;;  %v275_v60 = vld [vmem:[%s1153_s5 + $0xf0] sm:$0xff] }
  0x22   :  { %667 = vmatprep.subr.bf16.mxu1 %v666_v9  ;;  %v694_v51 = vpack.c.bf16 %v274_v49, %v273_v48  ;;  %v257_v57 = vld [vmem:[%s1153_s5 + $0x60] sm:$0xff]  ;;  %v258_v58 = vld [vmem:[%s1153_s5 + $0x68] sm:$0xff]  ;;  %v276_v61 = vld [vmem:[%s1153_s5 + $0xf8] sm:$0xff] }
  0x23   :  { %577 = vmatmul.mubr.f32.vlgmr.msra.gmra.mrb[0].mxu0 %v33_v5  ;;  %v696_v59 = vpack.c.bf16 %v258_v58, %v257_v57  ;;  %v698_v62 = vpack.c.bf16 %v276_v61, %v275_v60  ;;  %v260_v63 = vld [vmem:[%s1153_s5 + $0x78] sm:$0xff]  ;;  %v355_v1 = vld [vmem:[%s1155_s7] sm:$0xff]  ;;  %v356_v2 = vld [vmem:[%s1155_s7 + $0x8] sm:$0xff] }
  0x24   :  { %673 = vmatpush3.bf16.msra.mxu0 %v672_v20  ;;  %v357_v4 = vld [vmem:[%s1155_s7 + $0x10] sm:$0xff]  ;;  %v703_v5 = vpack.c.bf16 %v356_v2, %v355_v1  ;;  %v358_v7 = vld [vmem:[%s1155_s7 + $0x18] sm:$0xff]  ;;  %v359_v9 = vld [vmem:[%s1155_s7 + $0x20] sm:$0xff] }
  0x25   :  { %669 = vmatpush1.bf16.msra.mxu1 %v668_v12  ;;  %675 = vmatprep.subr.bf16.mxu0 %v674_v21  ;;  %v706_v8 = vpack.c.bf16 %v358_v7, %v357_v4  ;;  %v360_v10 = vld [vmem:[%s1155_s7 + $0x28] sm:$0xff]  ;;  %v361_v12 = vld [vmem:[%s1155_s7 + $0x30] sm:$0xff]  ;;  %v362_v13 = vld [vmem:[%s1155_s7 + $0x38] sm:$0xff]  ;;  %v162_v21 = vlaneseq }
  0x26   :  { %702 = vmatprep.subr.bf16.mxu1 %v758_v3  ;;  %v709_v11 = vpack.c.bf16 %v360_v10, %v359_v9  ;;  %v712_v14 = vpack.c.bf16 %v362_v13, %v361_v12  ;;  %v363_v15 = vld [vmem:[%s1155_s7 + $0x40] sm:$0xff]  ;;  %v364_v16 = vld [vmem:[%s1155_s7 + $0x48] sm:$0xff]  ;;  %v365_v18 = vld [vmem:[%s1155_s7 + $0x50] sm:$0xff] }
  0x27   :  { %v715_v17 = vpack.c.bf16 %v364_v16, %v363_v15  ;;  %v366_v19 = vld [vmem:[%s1155_s7 + $0x58] sm:$0xff]  ;;  %v163_v22 = vshrl.u32 %v162_v21, 7  ;;  %v160_v24 = vld [vmem:[%s1152_s4] sm:$0x3]  ;;  %v368_v35 = vld [vmem:[%s1155_s7 + $0x68] sm:$0xff] }
  0x28   :  { %677 = vmatpush3.bf16.msra.mxu0 %v676_v26  ;;  %v718_v20 = vpack.c.bf16 %v366_v19, %v365_v18  ;;  %v367_v34 = vld [vmem:[%s1155_s7 + $0x60] sm:$0xff]  ;;  %v369_v37 = vld [vmem:[%s1155_s7 + $0x70] sm:$0xff] }
  0x29   :  { %679 = vmatprep.subr.bf16.mxu0 %v678_v27  ;;  %v164_v23 = vsub.s32 0, %v163_v22  ;;  %v168_v25 = vsub.s32 1, %v163_v22  ;;  %v721_v36 = vpack.c.bf16 %v368_v35, %v367_v34  ;;  %v473_v41 = vld [vmem:[%s1154_s6] ss:$0 sm:$0xff]  ;;  %s761_s6 = smov [#allocation2]  }
  0x2b   :  { %v165_v26 = vrot.slane %v160_v24, %v164_v23  ;;  %v169_v27 = vrot.slane %v160_v24, %v168_v25 }
  0x2c   :  { %681 = vmatpush3.bf16.msra.mxu0 %v680_v32 }
  0x2d   :  { %683 = vmatprep.subr.bf16.mxu0 %v682_v33 }
  0x30   :  { %685 = vmatpush3.bf16.msra.mxu0 %v684_v38  ;;  %v370_v38 = vld [vmem:[%s1155_s7 + $0x78] sm:$0xff]  ;;  %s464_s7 = sshll.u32 %s761_s6, 4  ;;  %s465_s7 = int_to_ptr.vmem [resolvable:$true] %s464_s7 }
  0x31   :  { %687 = vmatprep.subr.bf16.mxu0 %v686_v39  ;;  %v724_v39 = vpack.c.bf16 %v370_v38, %v369_v37  ;;  %s734_s24 = scalar_lea.vmem %s465_s7, 128  ;;  %p739_p1 = scmp.lt.s32.totalorder %s465_s7, %s465_s7 }
  0x32   :  { %p735_p0 = scmp.ne.s32.totalorder %s465_s7, %s734_s24  ;;  %p740_p2 = scmp.lt.s32.totalorder %s734_s24, %s734_s24 }
  0x34   :  { %689 = vmatpush3.bf16.msra.mxu0 %v688_v44  ;;  %p741_p3 = por %p740_p2, %p739_p1 }
  0x35   :  { %691 = vmatprep.subr.bf16.mxu0 %v690_v45 }
  0x36   :  { %p742_p4 = pnand %p741_p3, %p735_p0 }
  0x38   :  { %693 = vmatpush3.bf16.msra.mxu0 %v692_v50 }
  0x39   :  { %695 = vmatprep.subr.bf16.mxu0 %v694_v51 }
  0x3c   :  { %697 = vmatpush3.bf16.msra.mxu0 %v696_v59 }
  0x3d   :  { %699 = vmatprep.subr.bf16.mxu0 %v698_v62 }
  0xf6   :  { %v123_v53 = vpop.f32.mrb[0].mxu0 }
  0xf7   :  { %v124_v54 = vadd.f32 %v472_v52, %v123_v53  ;;  %v578_v55 = vpop.f32.mrb[1].mxu0 }
  0xf9   :  { %v127_v56 = vmax.f32 %v124_v54, 0.0 }
  0xfb   :  { %237 = vmatmul.mubr.f32.vlgmr.msra.gmra.mrb[0].mxu1 %v127_v56 }
  0xfc   :  { %611 = vmatprep.mubr.msk.f32.mxu1 %vm759_vm0, %v760_v6  ;;  %v259_v6 = vld [vmem:[%s1153_s5 + $0x70] sm:$0xff]  ;;  %704 = vmatpush3.bf16.msra.mxu1 %v703_v5 }
  0xfd   :  { %v700_v0 = vpack.c.bf16 %v260_v63, %v259_v6  ;;  %705 = vmatprep.subr.bf16.mxu1 %v758_v3 }
  0xff   :  { %701 = vmatpush3.bf16.msra.mxu0 %v700_v0 }
 0x100   :  { %707 = vmatpush3.bf16.msra.mxu1 %v706_v8 }
 0x101   :  { %708 = vmatprep.subr.bf16.mxu1 %v758_v3 }
 0x104   :  { %710 = vmatpush3.bf16.msra.mxu1 %v709_v11 }
 0x105   :  { %711 = vmatprep.subr.bf16.mxu1 %v758_v3 }
 0x108   :  { %713 = vmatpush3.bf16.msra.mxu1 %v712_v14 }
 0x109   :  { %714 = vmatprep.subr.bf16.mxu1 %v758_v3 }
 0x10c   :  { %716 = vmatpush3.bf16.msra.mxu1 %v715_v17 }
 0x10d   :  { %717 = vmatprep.subr.bf16.mxu1 %v758_v3 }
 0x110   :  { %719 = vmatpush3.bf16.msra.mxu1 %v718_v20 }
 0x111   :  { %720 = vmatprep.subr.bf16.mxu1 %v758_v3 }
 0x114   :  { %722 = vmatpush3.bf16.msra.mxu1 %v721_v36 }
 0x115   :  { %723 = vmatprep.subr.bf16.mxu1 %v758_v3  ;;  %v474_v3 = vld [vmem:[%s1156_s8] ss:$0 sm:$0xff] }
 0x118   :  { %725 = vmatpush3.bf16.msra.mxu1 %v724_v39 }
 0x1ce   :  { %v238_v28 = vpop.f32.mrb[0].mxu1 }
 0x1cf   :  { %v239_v29 = vadd.f32 %v238_v28, %v165_v26  ;;  %v240_v30 = vpop.f32.mrb[1].mxu1 }
 0x1d0   :  { %v241_v31 = vadd.f32 %v240_v30, %v169_v27 }
 0x1d1   :  { %v243_v33 = vmax.f32 %v239_v29, 0.0 }
 0x1d2   :  { %v244_v32 = vmax.f32 %v241_v31, 0.0 }
 0x1d4   :  { %348 = vmatprep.mubr.f32.mxu0 %v244_v32 }
 0x1d5   :  { %349 = vmatmul.mubr.f32.vlgmr.msra.gmra.mrb[2].mxu0 %v243_v33 }
 0x2a8   :  { %v524_v40 = vpop.f32.mrb[2].mxu0 }
 0x2a9   :  { %v525_v42 = vpop.f32.mrb[3].mxu0 }
 0x2aa   :  { %v526_v43 = vadd.f32 %v525_v42, %v524_v40 }
 0x2ac   :  { %v351_v44 = vadd.f32 %v526_v43, %v473_v41 }
 0x2ae   :  { %v354_v45 = vmax.f32 %v351_v44, 0.0 }
 0x2b0   :  { %612 = vmatmul.mubr.f32.vlgmr.msra.gmra.mrb[2].mxu1 %v354_v45 }
 0x383   :  { %v444_v46 = vpop.f32.mrb[2].mxu1 }
 0x384   :  { %v445_v47 = vadd.f32 %v474_v3, %v444_v46  ;;  %v613_v48 = vpop.f32.mrb[3].mxu1 }
 0x386   :  { %448 = vmax.xlane.f32.xlu0 %v445_v47 }
 0x413   :  { %v449_v49 = vpop.xlane.xlu0 %448 }
 0x414   :  { %v450_v50 = vsub.f32 %v445_v47, %v449_v49 }
 0x416   :  { %v451_v51 = vmul.f32 1.442695, %v450_v50 }
 0x418   :  { %730 = vpow2.f32 %v451_v51 }
 0x422   :  { %v731_v52 = vpop.eup %730 }
 0x423   :  { %453 = vadd.xlane.f32.xlu0 %v731_v52 }
 0x4b0   :  { %v454_v53 = vpop.xlane.xlu0 %453 }
 0x4b1   :  { %732 = vrcp.f32 %v454_v53 }
 0x4bb   :  { %v733_v54 = vpop.eup %732 }
 0x4bc   :  { %v456_v55 = vmul.f32 %v733_v54, %v731_v52 }
 0x4be   :  { %457 = vst [vmem:[#allocation2] sm:$0xff] %v456_v55 }
 0x4bf   :  { %745 = shalt.err (!%p742_p4)
}
 0x4c0   :  { %s746_s26 = scalar_lea.hbm %s1157_s9, 128 }
 0x4c1   :  { %p747_p5 = scmp.ne.s32.totalorder %s1157_s9, %s746_s26  ;;  %p750_p6 = scmp.lt.u32.totalorder %s746_s26, %s1157_s9 }
 0x4c3   :  { %p752_p7 = pnand %p750_p6, %p747_p5 }
 0x4c5   :  { %755 = shalt.err (!%p752_p7)
}
 0x4c6   :  { %467 = dma.vmem_to_hbm [thread:$0]  %s465_s7, 128, %s1157_s9, [#allocation3]  }
 0x4c7   :  { %756 = dma.done.wait [#allocation3], 128  }
 0x4c8   :  { %757 = vsyncadd [#allocation3], 4294967168 }
 0x4c9   :  { %471 = vsyncpa [#allocation3], 1 }

</bundles_post_ra>
